<compile_context>
chip_gen: v7x
topology: tpu7x:2x2x1
jax: 0.10.0
libtpu: 0.0.40
codegen_flags: <defaults>
</compile_context>

<pallas_src>
import functools

import jax
import jax.numpy as jnp
import numpy as np
from jax.experimental import pallas as pl
from jax.experimental.pallas import tpu as pltpu


def _basic_block_kernel(x_ref, wb1_ref, s1_ref, b1_ref, wb2_ref, s2_ref,
                        b2_ref, o_ref, slab1_ref, slab2_ref, *, nb, H, W,
                        cin, cout):
    """Fused conv3x3 -> BN -> ReLU -> conv3x3 -> BN -> +residual -> ReLU.

    Nb images per grid step; activations are flattened NHWC rows (W*C lanes).

      x_ref    : (nb, H, W*cin)        f32   input rows (also the residual)
      wb*_ref  : (3, W*c, W*cout)      bf16  banded conv weights (per kh row)
      s*_/b*_  : (1, W*cout)           f32   folded BN affine, tiled over W
      o_ref    : (nb, H, W*cout)       f32   output rows
      slab1_ref: (nb*(H+1)+2, W*cin)   bf16  conv1 input slab (row halo only)
      slab2_ref: (nb*(H+1)+1, W*cout)  bf16  conv2 input slab
    """
    wcin = W * cin
    wcout = W * cout
    P = H + 1                 # per-image row pitch inside the slabs
    M1 = nb * P               # conv1 matmul rows (incl. inter-image rows)
    M2 = nb * P - 1           # conv2 matmul rows

    # ---- stage conv1 input (bf16, cast once, lane offset 0) ----------------
    # slab1 rows:  0            extra zero (aligns the slab2 bulk store below)
    #              1 + n*P      zero: top pad of image n / bottom pad of n-1
    #              2 + n*P + h  image n, row h
    #              1 + nb*P     zero: bottom pad of the last image
    # Scratch is per-core and persists across grid steps, so every row the
    # convs read is rewritten each step (correct under "parallel" sharding).
    zin = jnp.zeros((1, wcin), jnp.bfloat16)
    slab1_ref[0:1, :] = zin
    for n in range(nb):
        slab1_ref[1 + n * P:2 + n * P, :] = zin
        slab1_ref[2 + n * P:2 + n * P + H, :] = x_ref[n].astype(jnp.bfloat16)
    slab1_ref[1 + nb * P:2 + nb * P, :] = zin

    # ---- conv1: 3 banded bf16 MXU matmuls (one per kernel row), f32 acc ----
    acc1 = jnp.zeros((M1, wcout), jnp.float32)
    for kh in range(3):
        acc1 = acc1 + jnp.dot(slab1_ref[kh:kh + M1, :], wb1_ref[kh],
                              preferred_element_type=jnp.float32)

    # ---- bn1 (folded affine) + relu, restage for conv2 ---------------------
    # Valid conv1 rows sit at j = 1 + n*P + h; rows j = p*P are inter-image
    # garbage and are overwritten by the zero rows written after the bulk
    # store (which is sublane-aligned at offset 0 thanks to slab1's extra row).
    y1 = jnp.maximum(acc1 * s1_ref[...] + b1_ref[...], 0.0)
    slab2_ref[0:M1, :] = y1.astype(jnp.bfloat16)      # aligned bulk store
    zmid = jnp.zeros((1, wcout), jnp.bfloat16)
    for p in range(nb + 1):
        slab2_ref[p * P:p * P + 1, :] = zmid          # image-boundary zeros

    # ---- conv2 --------------------------------------------------------------
    acc2 = jnp.zeros((M2, wcout), jnp.float32)
    for kh in range(3):
        acc2 = acc2 + jnp.dot(slab2_ref[kh:kh + M2, :], wb2_ref[kh],
                              preferred_element_type=jnp.float32)

    # ---- bn2 + residual add (f32) + relu, per-image writeback ---------------
    for n in range(nb):
        out_n = acc2[n * P:n * P + H, :] * s2_ref[...] + b2_ref[...] + x_ref[n]
        o_ref[n] = jnp.maximum(out_n, 0.0).astype(o_ref.dtype)


def _banded_conv_weights(w_hwio, width):
    """(3,3,Cin,Cout) HWIO weights -> (3, width*Cin, width*Cout) bf16.

    wb[kh] is the block-banded matrix such that, for row-flattened image rows
    r[j*Cin + ci] = x[row, j, ci] (lane offset 0, NO column halo),
        sum_kh  rows[kh:kh+M, :] @ wb[kh]
    equals the stride-1, pad-1 3x3 convolution flattened to (M, width*Cout).
    Out-of-image column taps map to zero weight rows, so the kernel never
    stages (or zeroes) a column halo.  Built once per call in the wrapper;
    tiny at demo widths and reused by every grid step.
    """
    kh_, kw_, cin, cout = w_hwio.shape
    K = width * cin
    band = kw_ * cin
    slabs = w_hwio.reshape(kh_, band, cout)                      # (3, 3*cin, cout)
    # lane j*cin + ci contributes tap kw = j - w + 1 to output column w
    rel = jnp.arange(K)[:, None] - (jnp.arange(width) * cin - cin)[None, :]
    valid = (rel >= 0) & (rel < band)
    relc = jnp.clip(rel, 0, band - 1)

    def one(slab):
        g = jnp.where(valid[:, :, None], slab[relc], 0.0)        # (K, W, cout)
        return g.reshape(K, width * cout)

    return jax.vmap(one)(slabs).astype(jnp.bfloat16)


def _pick_batch_block(n, h, lanes_out):
    """Images per grid step (Nb).

    Targets a per-conv matmul height M = Nb*(H+1) of ~256-512 rows (fills the
    256-tall v6e/v7x MXU and amortizes the ~0.35 us per-grid-step overhead),
    subject to: (a) keep >= 2 grid steps when N >= 2 so both v7x TensorCores
    receive work, and (b) cap the f32 accumulator (M x W*Cout) at ~128 KiB so
    it stays vreg/VMEM friendly instead of turning the kernel spill-bound.
    """
    max_rows = min(512, max(h + 1, (128 * 1024) // (4 * lanes_out)))
    best = 1
    for nb in range(1, n + 1):
        if n % nb != 0:
            continue
        if n >= 2 and n // nb < 2:      # keep both v7x TensorCores busy
            continue
        if nb * (h + 1) > max_rows:
            continue
        best = nb
    return best


@jax.jit
def basic_block_forward(x_nhwc, w1, s1, b1, w2, s2, b2):
    """BasicBlock forward.  x_nhwc: (N, H, W, C) f32.  Returns NHWC f32.

    The block is NHWC end-to-end (convert NCHW once at the network boundary,
    not per block).  The kernel sees activations as flattened (N, H, W*C)
    rows, which is a free, metadata-only reshape.
    """
    N, H, W, cin = x_nhwc.shape
    cout = w1.shape[-1]
    assert w1.shape == (3, 3, cin, cout) and w2.shape == (3, 3, cout, cout)
    assert cin == cout, "identity residual requires inplanes == planes"
    # Banded weights scale as (W*C)^2: guard the small-C regime this kernel
    # targets (see TODO at the top for the production-size formulation).
    banded_bytes = 3 * 2 * ((W * cin) * (W * cout) + (W * cout) ** 2)
    assert banded_bytes <= 8 * 1024 * 1024, (
        "banded-weight path is for small W*C; use per-kh K=3*Cin matmuls")

    nb = _pick_batch_block(N, H, W * cout)
    assert N % nb == 0
    wc = W * cout
    P = H + 1

    x_rows = x_nhwc.reshape(N, H, W * cin)              # free row-major flatten
    wb1 = _banded_conv_weights(w1, W)                   # (3, W*cin, W*cout)
    wb2 = _banded_conv_weights(w2, W)                   # (3, W*cout, W*cout)
    s1w = jnp.tile(s1.astype(jnp.float32), W)[None, :]  # (1, W*cout)
    b1w = jnp.tile(b1.astype(jnp.float32), W)[None, :]
    s2w = jnp.tile(s2.astype(jnp.float32), W)[None, :]
    b2w = jnp.tile(b2.astype(jnp.float32), W)[None, :]

    # Grid-invariant operands (banded weights / BN affines): fetched once and
    # single-buffered so they do not pay a second pipeline buffer in VMEM.
    def inv3(shape):
        return pl.BlockSpec(shape, lambda i: (0, 0, 0),
                            pipeline_mode=pl.Buffered(1))

    def inv2(shape):
        return pl.BlockSpec(shape, lambda i: (0, 0),
                            pipeline_mode=pl.Buffered(1))

    kernel = functools.partial(_basic_block_kernel, nb=nb, H=H, W=W,
                               cin=cin, cout=cout)
    out_rows = pl.pallas_call(
        kernel,
        out_shape=jax.ShapeDtypeStruct((N, H, wc), x_nhwc.dtype),
        grid_spec=pltpu.PrefetchScalarGridSpec(
            num_scalar_prefetch=0,
            grid=(N // nb,),
            in_specs=[
                pl.BlockSpec((nb, H, W * cin), lambda i: (i, 0, 0)),
                inv3((3, W * cin, wc)),
                inv2((1, wc)),
                inv2((1, wc)),
                inv3((3, wc, wc)),
                inv2((1, wc)),
                inv2((1, wc)),
            ],
            out_specs=pl.BlockSpec((nb, H, wc), lambda i: (i, 0, 0)),
            scratch_shapes=[
                pltpu.VMEM((nb * P + 2, W * cin), jnp.bfloat16),
                pltpu.VMEM((nb * P + 1, wc), jnp.bfloat16),
            ],
        ),
        # VMEM budget (re-derive if tiles grow, esp. on v7x's 64 MiB part):
        # double-buffered x/out blocks + single-buffered weights + two bf16
        # slabs.  At the demo size this is ~0.1 MiB; the limit below is safe
        # on v5e/v6e/v7x alike.
        compiler_params=pltpu.CompilerParams(
            dimension_semantics=("parallel",),
            vmem_limit_bytes=32 * 1024 * 1024,
        ),
    )(x_rows, wb1, s1w, b1w, wb2, s2w, b2w)
    return out_rows.reshape(N, H, W, cout)


def _fold_bn(gamma, beta, running_mean, running_var, eps=1e-5):
    scale = gamma / jnp.sqrt(running_var + eps)
    shift = beta - running_mean * scale
    return scale, shift


def _reference_nhwc(x, w1, s1, b1, w2, s2, b2):
    """Pure-JAX NHWC reference mirroring the kernel's mixed precision:
    conv operands rounded to bf16, products and accumulation in f32."""
    def conv3x3(inp, w):
        inp = inp.astype(jnp.bfloat16).astype(jnp.float32)
        w = w.astype(jnp.bfloat16).astype(jnp.float32)
        dn = jax.lax.conv_dimension_numbers(inp.shape, w.shape,
                                            ('NHWC', 'HWIO', 'NHWC'))
        return jax.lax.conv_general_dilated(inp, w, (1, 1), 'SAME',
                                            dimension_numbers=dn)

    y = jnp.maximum(conv3x3(x, w1) * s1 + b1, 0.0)
    y = conv3x3(y, w2) * s2 + b2
    return jnp.maximum(y + x, 0.0)


if __name__ == "__main__":
    # BasicBlock(inplanes=4, planes=4, stride=1, downsample=None)
    N, Cin, H, W = 2, 4, 16, 16
    planes = Cin  # no downsample => residual shape must match

    key = jax.random.PRNGKey(0)
    keys = jax.random.split(key, 11)

    # Module-native NCHW input; converted to NHWC once at the network boundary.
    x_nchw = jax.random.normal(keys[0], (N, Cin, H, W), jnp.float32)
    x_nhwc = jnp.transpose(x_nchw, (0, 2, 3, 1))

    # conv weights, HWIO layout (3, 3, Cin, Cout), bias=False
    w1 = jax.random.normal(keys[1], (3, 3, Cin, planes), jnp.float32) * 0.2
    w2 = jax.random.normal(keys[2], (3, 3, planes, planes), jnp.float32) * 0.2

    # BatchNorm parameters (deterministic, eval-mode folding)
    gamma1 = 1.0 + 0.1 * jax.random.normal(keys[3], (planes,), jnp.float32)
    beta1 = 0.1 * jax.random.normal(keys[4], (planes,), jnp.float32)
    mean1 = 0.1 * jax.random.normal(keys[5], (planes,), jnp.float32)
    var1 = jnp.abs(jax.random.normal(keys[6], (planes,), jnp.float32)) + 0.5

    gamma2 = 1.0 + 0.1 * jax.random.normal(keys[7], (planes,), jnp.float32)
    beta2 = 0.1 * jax.random.normal(keys[8], (planes,), jnp.float32)
    mean2 = 0.1 * jax.random.normal(keys[9], (planes,), jnp.float32)
    var2 = jnp.abs(jax.random.normal(keys[10], (planes,), jnp.float32)) + 0.5

    s1, b1 = _fold_bn(gamma1, beta1, mean1, var1)
    s2, b2 = _fold_bn(gamma2, beta2, mean2, var2)

    out = jax.block_until_ready(
        basic_block_forward(x_nhwc, w1, s1, b1, w2, s2, b2))
    ref = jax.block_until_ready(
        _reference_nhwc(x_nhwc, w1, s1, b1, w2, s2, b2))

    # bf16 MXU operands: kernel and reference may round the intermediate
    # activation to adjacent bf16 values (1 ulp ~ 0.4%), so the tolerance is
    # set at mixed-precision level (still far below any real-bug signal).
    np.testing.assert_allclose(np.asarray(out), np.asarray(ref),
                               rtol=1e-2, atol=3e-2)

    print("KERNEL_OK")
</pallas_src>

<mosaic_0001>
module attributes {stable_mosaic.version = 11 : i64} {
  func.func @_basic_block_kernel(%arg0: i32, %arg1: memref<1x16x64xf32, #tpu.memory_space<vmem>>, %arg2: memref<3x64x64xbf16, #tpu.memory_space<vmem>>, %arg3: memref<1x64xf32, #tpu.memory_space<vmem>>, %arg4: memref<1x64xf32, #tpu.memory_space<vmem>>, %arg5: memref<3x64x64xbf16, #tpu.memory_space<vmem>>, %arg6: memref<1x64xf32, #tpu.memory_space<vmem>>, %arg7: memref<1x64xf32, #tpu.memory_space<vmem>>, %arg8: memref<1x16x64xf32, #tpu.memory_space<vmem>>, %arg9: memref<19x64xbf16, #tpu.memory_space<vmem>>, %arg10: memref<18x64xbf16, #tpu.memory_space<vmem>>) attributes {dimension_semantics = [#tpu.dimension_semantics<parallel>], iteration_bounds = array<i64: 2>, scalar_prefetch = 0 : i64, scratch_operands = 2 : i64, tpu.core_type = #tpu.core_type<tc>, window_params = [{transform_indices = @transform_0, window_bounds = array<i64: 1, 16, 64>}, {pipeline_mode = #tpu.pipeline_mode<synchronous>, transform_indices = @transform_1, window_bounds = array<i64: 3, 64, 64>}, {pipeline_mode = #tpu.pipeline_mode<synchronous>, transform_indices = @transform_2, window_bounds = array<i64: 1, 64>}, {pipeline_mode = #tpu.pipeline_mode<synchronous>, transform_indices = @transform_3, window_bounds = array<i64: 1, 64>}, {pipeline_mode = #tpu.pipeline_mode<synchronous>, transform_indices = @transform_4, window_bounds = array<i64: 3, 64, 64>}, {pipeline_mode = #tpu.pipeline_mode<synchronous>, transform_indices = @transform_5, window_bounds = array<i64: 1, 64>}, {pipeline_mode = #tpu.pipeline_mode<synchronous>, transform_indices = @transform_6, window_bounds = array<i64: 1, 64>}, {transform_indices = @transform_7, window_bounds = array<i64: 1, 16, 64>}]} {
    %cst = arith.constant 0.000000e+00 : bf16
    %0 = vector.broadcast %cst : bf16 to vector<1x64xbf16>
    %c0 = arith.constant 0 : index
    %c0_0 = arith.constant 0 : index
    %1 = vector.load %arg9[%c0, %c0_0] : memref<19x64xbf16, #tpu.memory_space<vmem>>, vector<1x64xbf16>
    tpu.vector_store %arg9[%c0, %c0_0], %0 {strides = array<i32>} : memref<19x64xbf16, #tpu.memory_space<vmem>>, vector<1x64xbf16>,
    %c1 = arith.constant 1 : index
    %c0_1 = arith.constant 0 : index
    %2 = vector.load %arg9[%c1, %c0_1] : memref<19x64xbf16, #tpu.memory_space<vmem>>, vector<1x64xbf16>
    tpu.vector_store %arg9[%c1, %c0_1], %0 {strides = array<i32>} : memref<19x64xbf16, #tpu.memory_space<vmem>>, vector<1x64xbf16>,
    %c0_2 = arith.constant 0 : index
    %c0_3 = arith.constant 0 : index
    %c0_4 = arith.constant 0 : index
    %3 = vector.load %arg1[%c0_2, %c0_3, %c0_4] : memref<1x16x64xf32, #tpu.memory_space<vmem>>, vector<1x16x64xf32>
    %4 = vector.shape_cast %3 : vector<1x16x64xf32> to vector<16x64xf32>
    %5 = arith.truncf %4 : vector<16x64xf32> to vector<16x64xbf16>
    %c2 = arith.constant 2 : index
    %c0_5 = arith.constant 0 : index
    %6 = vector.load %arg9[%c2, %c0_5] : memref<19x64xbf16, #tpu.memory_space<vmem>>, vector<16x64xbf16>
    tpu.vector_store %arg9[%c2, %c0_5], %5 {strides = array<i32>} : memref<19x64xbf16, #tpu.memory_space<vmem>>, vector<16x64xbf16>,
    %c18 = arith.constant 18 : index
    %c0_6 = arith.constant 0 : index
    %7 = vector.load %arg9[%c18, %c0_6] : memref<19x64xbf16, #tpu.memory_space<vmem>>, vector<1x64xbf16>
    tpu.vector_store %arg9[%c18, %c0_6], %0 {strides = array<i32>} : memref<19x64xbf16, #tpu.memory_space<vmem>>, vector<1x64xbf16>,
    %cst_7 = arith.constant 0.000000e+00 : f32
    %8 = vector.broadcast %cst_7 : f32 to vector<17x64xf32>
    %c0_8 = arith.constant 0 : index
    %c0_9 = arith.constant 0 : index
    %9 = vector.load %arg9[%c0_8, %c0_9] : memref<19x64xbf16, #tpu.memory_space<vmem>>, vector<17x64xbf16>
    %c0_10 = arith.constant 0 : index
    %c0_11 = arith.constant 0 : index
    %c0_12 = arith.constant 0 : index
    %10 = vector.load %arg2[%c0_10, %c0_11, %c0_12] : memref<3x64x64xbf16, #tpu.memory_space<vmem>>, vector<1x64x64xbf16>
    %11 = vector.shape_cast %10 : vector<1x64x64xbf16> to vector<64x64xbf16>
    %cst_13 = arith.constant dense<0.000000e+00> : vector<17x64xf32>
    %12 = tpu.matmul %9, %11, %cst_13 {dimension_numbers = #tpu.dot_dimension_numbers<[1], [0], [0], [1], [0, 0, 1, 1], [], []>} : vector<17x64xbf16>, vector<64x64xbf16>, vector<17x64xf32> -> vector<17x64xf32>
    %13 = arith.addf %8, %12 : vector<17x64xf32>
    %c1_14 = arith.constant 1 : index
    %c0_15 = arith.constant 0 : index
    %14 = vector.load %arg9[%c1_14, %c0_15] : memref<19x64xbf16, #tpu.memory_space<vmem>>, vector<17x64xbf16>
    %c1_16 = arith.constant 1 : index
    %c0_17 = arith.constant 0 : index
    %c0_18 = arith.constant 0 : index
    %15 = vector.load %arg2[%c1_16, %c0_17, %c0_18] : memref<3x64x64xbf16, #tpu.memory_space<vmem>>, vector<1x64x64xbf16>
    %16 = vector.shape_cast %15 : vector<1x64x64xbf16> to vector<64x64xbf16>
    %cst_19 = arith.constant dense<0.000000e+00> : vector<17x64xf32>
    %17 = tpu.matmul %14, %16, %cst_19 {dimension_numbers = #tpu.dot_dimension_numbers<[1], [0], [0], [1], [0, 0, 1, 1], [], []>} : vector<17x64xbf16>, vector<64x64xbf16>, vector<17x64xf32> -> vector<17x64xf32>
    %18 = arith.addf %13, %17 : vector<17x64xf32>
    %c2_20 = arith.constant 2 : index
    %c0_21 = arith.constant 0 : index
    %19 = vector.load %arg9[%c2_20, %c0_21] : memref<19x64xbf16, #tpu.memory_space<vmem>>, vector<17x64xbf16>
    %c2_22 = arith.constant 2 : index
    %c0_23 = arith.constant 0 : index
    %c0_24 = arith.constant 0 : index
    %20 = vector.load %arg2[%c2_22, %c0_23, %c0_24] : memref<3x64x64xbf16, #tpu.memory_space<vmem>>, vector<1x64x64xbf16>
    %21 = vector.shape_cast %20 : vector<1x64x64xbf16> to vector<64x64xbf16>
    %cst_25 = arith.constant dense<0.000000e+00> : vector<17x64xf32>
    %22 = tpu.matmul %19, %21, %cst_25 {dimension_numbers = #tpu.dot_dimension_numbers<[1], [0], [0], [1], [0, 0, 1, 1], [], []>} : vector<17x64xbf16>, vector<64x64xbf16>, vector<17x64xf32> -> vector<17x64xf32>
    %23 = arith.addf %18, %22 : vector<17x64xf32>
    %c0_26 = arith.constant 0 : index
    %c0_27 = arith.constant 0 : index
    %24 = vector.load %arg3[%c0_26, %c0_27] : memref<1x64xf32, #tpu.memory_space<vmem>>, vector<1x64xf32>
    %25 = vector.broadcast %24 : vector<1x64xf32> to vector<17x64xf32>
    %26 = arith.mulf %23, %25 : vector<17x64xf32>
    %c0_28 = arith.constant 0 : index
    %c0_29 = arith.constant 0 : index
    %27 = vector.load %arg4[%c0_28, %c0_29] : memref<1x64xf32, #tpu.memory_space<vmem>>, vector<1x64xf32>
    %28 = vector.broadcast %27 : vector<1x64xf32> to vector<17x64xf32>
    %29 = arith.addf %26, %28 : vector<17x64xf32>
    %cst_30 = arith.constant 0.000000e+00 : f32
    %30 = vector.broadcast %cst_30 : f32 to vector<17x64xf32>
    %31 = arith.maximumf %29, %30 : vector<17x64xf32>
    %32 = arith.truncf %31 : vector<17x64xf32> to vector<17x64xbf16>
    %c0_31 = arith.constant 0 : index
    %c0_32 = arith.constant 0 : index
    %33 = vector.load %arg10[%c0_31, %c0_32] : memref<18x64xbf16, #tpu.memory_space<vmem>>, vector<17x64xbf16>
    tpu.vector_store %arg10[%c0_31, %c0_32], %32 {strides = array<i32>} : memref<18x64xbf16, #tpu.memory_space<vmem>>, vector<17x64xbf16>,
    %cst_33 = arith.constant 0.000000e+00 : bf16
    %34 = vector.broadcast %cst_33 : bf16 to vector<1x64xbf16>
    %c0_34 = arith.constant 0 : index
    %c0_35 = arith.constant 0 : index
    %35 = vector.load %arg10[%c0_34, %c0_35] : memref<18x64xbf16, #tpu.memory_space<vmem>>, vector<1x64xbf16>
    tpu.vector_store %arg10[%c0_34, %c0_35], %34 {strides = array<i32>} : memref<18x64xbf16, #tpu.memory_space<vmem>>, vector<1x64xbf16>,
    %c17 = arith.constant 17 : index
    %c0_36 = arith.constant 0 : index
    %36 = vector.load %arg10[%c17, %c0_36] : memref<18x64xbf16, #tpu.memory_space<vmem>>, vector<1x64xbf16>
    tpu.vector_store %arg10[%c17, %c0_36], %34 {strides = array<i32>} : memref<18x64xbf16, #tpu.memory_space<vmem>>, vector<1x64xbf16>,
    %cst_37 = arith.constant 0.000000e+00 : f32
    %37 = vector.broadcast %cst_37 : f32 to vector<16x64xf32>
    %c0_38 = arith.constant 0 : index
    %c0_39 = arith.constant 0 : index
    %38 = vector.load %arg10[%c0_38, %c0_39] : memref<18x64xbf16, #tpu.memory_space<vmem>>, vector<16x64xbf16>
    %c0_40 = arith.constant 0 : index
    %c0_41 = arith.constant 0 : index
    %c0_42 = arith.constant 0 : index
    %39 = vector.load %arg5[%c0_40, %c0_41, %c0_42] : memref<3x64x64xbf16, #tpu.memory_space<vmem>>, vector<1x64x64xbf16>
    %40 = vector.shape_cast %39 : vector<1x64x64xbf16> to vector<64x64xbf16>
    %cst_43 = arith.constant dense<0.000000e+00> : vector<16x64xf32>
    %41 = tpu.matmul %38, %40, %cst_43 {dimension_numbers = #tpu.dot_dimension_numbers<[1], [0], [0], [1], [0, 0, 1, 1], [], []>} : vector<16x64xbf16>, vector<64x64xbf16>, vector<16x64xf32> -> vector<16x64xf32>
    %42 = arith.addf %37, %41 : vector<16x64xf32>
    %c1_44 = arith.constant 1 : index
    %c0_45 = arith.constant 0 : index
    %43 = vector.load %arg10[%c1_44, %c0_45] : memref<18x64xbf16, #tpu.memory_space<vmem>>, vector<16x64xbf16>
    %c1_46 = arith.constant 1 : index
    %c0_47 = arith.constant 0 : index
    %c0_48 = arith.constant 0 : index
    %44 = vector.load %arg5[%c1_46, %c0_47, %c0_48] : memref<3x64x64xbf16, #tpu.memory_space<vmem>>, vector<1x64x64xbf16>
    %45 = vector.shape_cast %44 : vector<1x64x64xbf16> to vector<64x64xbf16>
    %cst_49 = arith.constant dense<0.000000e+00> : vector<16x64xf32>
    %46 = tpu.matmul %43, %45, %cst_49 {dimension_numbers = #tpu.dot_dimension_numbers<[1], [0], [0], [1], [0, 0, 1, 1], [], []>} : vector<16x64xbf16>, vector<64x64xbf16>, vector<16x64xf32> -> vector<16x64xf32>
    %47 = arith.addf %42, %46 : vector<16x64xf32>
    %c2_50 = arith.constant 2 : index
    %c0_51 = arith.constant 0 : index
    %48 = vector.load %arg10[%c2_50, %c0_51] : memref<18x64xbf16, #tpu.memory_space<vmem>>, vector<16x64xbf16>
    %c2_52 = arith.constant 2 : index
    %c0_53 = arith.constant 0 : index
    %c0_54 = arith.constant 0 : index
    %49 = vector.load %arg5[%c2_52, %c0_53, %c0_54] : memref<3x64x64xbf16, #tpu.memory_space<vmem>>, vector<1x64x64xbf16>
    %50 = vector.shape_cast %49 : vector<1x64x64xbf16> to vector<64x64xbf16>
    %cst_55 = arith.constant dense<0.000000e+00> : vector<16x64xf32>
    %51 = tpu.matmul %48, %50, %cst_55 {dimension_numbers = #tpu.dot_dimension_numbers<[1], [0], [0], [1], [0, 0, 1, 1], [], []>} : vector<16x64xbf16>, vector<64x64xbf16>, vector<16x64xf32> -> vector<16x64xf32>
    %52 = arith.addf %47, %51 : vector<16x64xf32>
    %c0_56 = arith.constant 0 : index
    %c0_57 = arith.constant 0 : index
    %53 = vector.load %arg6[%c0_56, %c0_57] : memref<1x64xf32, #tpu.memory_space<vmem>>, vector<1x64xf32>
    %54 = vector.broadcast %53 : vector<1x64xf32> to vector<16x64xf32>
    %55 = arith.mulf %52, %54 : vector<16x64xf32>
    %c0_58 = arith.constant 0 : index
    %c0_59 = arith.constant 0 : index
    %56 = vector.load %arg7[%c0_58, %c0_59] : memref<1x64xf32, #tpu.memory_space<vmem>>, vector<1x64xf32>
    %57 = vector.broadcast %56 : vector<1x64xf32> to vector<16x64xf32>
    %58 = arith.addf %55, %57 : vector<16x64xf32>
    %c0_60 = arith.constant 0 : index
    %c0_61 = arith.constant 0 : index
    %c0_62 = arith.constant 0 : index
    %59 = vector.load %arg1[%c0_60, %c0_61, %c0_62] : memref<1x16x64xf32, #tpu.memory_space<vmem>>, vector<1x16x64xf32>
    %60 = vector.shape_cast %59 : vector<1x16x64xf32> to vector<16x64xf32>
    %61 = arith.addf %58, %60 : vector<16x64xf32>
    %cst_63 = arith.constant 0.000000e+00 : f32
    %62 = vector.broadcast %cst_63 : f32 to vector<16x64xf32>
    %63 = arith.maximumf %61, %62 : vector<16x64xf32>
    %c0_64 = arith.constant 0 : index
    %c0_65 = arith.constant 0 : index
    %c0_66 = arith.constant 0 : index
    %64 = vector.load %arg8[%c0_64, %c0_65, %c0_66] : memref<1x16x64xf32, #tpu.memory_space<vmem>>, vector<1x16x64xf32>
    %65 = vector.shape_cast %64 : vector<1x16x64xf32> to vector<16x64xf32>
    %66 = vector.shape_cast %63 : vector<16x64xf32> to vector<1x16x64xf32>
    tpu.vector_store %arg8[%c0_64, %c0_65, %c0_66], %66 {strides = array<i32>} : memref<1x16x64xf32, #tpu.memory_space<vmem>>, vector<1x16x64xf32>,
    return
  }
  func.func @transform_0(%arg0: i32) -> (i32, i32, i32) {
    %c0_i32 = arith.constant 0 : i32
    %c0_i32_0 = arith.constant 0 : i32
    %c0_i32_1 = arith.constant 0 : i32
    return %arg0, %c0_i32, %c0_i32_0 : i32, i32, i32
  }
  func.func @transform_1(%arg0: i32) -> (i32, i32, i32) {
    %c0_i32 = arith.constant 0 : i32
    %c0_i32_0 = arith.constant 0 : i32
    %c0_i32_1 = arith.constant 0 : i32
    %c0_i32_2 = arith.constant 0 : i32
    return %c0_i32, %c0_i32_0, %c0_i32_1 : i32, i32, i32
  }
  func.func @transform_2(%arg0: i32) -> (i32, i32) {
    %c0_i32 = arith.constant 0 : i32
    %c0_i32_0 = arith.constant 0 : i32
    %c0_i32_1 = arith.constant 0 : i32
    return %c0_i32, %c0_i32_0 : i32, i32
  }
  func.func @transform_3(%arg0: i32) -> (i32, i32) {
    %c0_i32 = arith.constant 0 : i32
    %c0_i32_0 = arith.constant 0 : i32
    %c0_i32_1 = arith.constant 0 : i32
    return %c0_i32, %c0_i32_0 : i32, i32
  }
  func.func @transform_4(%arg0: i32) -> (i32, i32, i32) {
    %c0_i32 = arith.constant 0 : i32
    %c0_i32_0 = arith.constant 0 : i32
    %c0_i32_1 = arith.constant 0 : i32
    %c0_i32_2 = arith.constant 0 : i32
    return %c0_i32, %c0_i32_0, %c0_i32_1 : i32, i32, i32
  }
  func.func @transform_5(%arg0: i32) -> (i32, i32) {
    %c0_i32 = arith.constant 0 : i32
    %c0_i32_0 = arith.constant 0 : i32
    %c0_i32_1 = arith.constant 0 : i32
    return %c0_i32, %c0_i32_0 : i32, i32
  }
  func.func @transform_6(%arg0: i32) -> (i32, i32) {
    %c0_i32 = arith.constant 0 : i32
    %c0_i32_0 = arith.constant 0 : i32
    %c0_i32_1 = arith.constant 0 : i32
    return %c0_i32, %c0_i32_0 : i32, i32
  }
  func.func @transform_7(%arg0: i32) -> (i32, i32, i32) {
    %c0_i32 = arith.constant 0 : i32
    %c0_i32_0 = arith.constant 0 : i32
    %c0_i32_1 = arith.constant 0 : i32
    return %arg0, %c0_i32, %c0_i32_0 : i32, i32, i32
  }
}

</mosaic_0001>

<bundles_post_ra>
// kernel: tile.23
= control target key start
LH: loop header
LB: loop body
LE: loop exit
PB: predicated region body
PF: predicated region fallthrough
CT: control target
= control target key end

     0   :  { %s28_s0 = inlined_call_operand.vmem [shape: f32[4], index: 0, kind: input, shape index: {}]   ;;  %s29_s1 = inlined_call_operand.vmem [shape: f32[16,4], index: 1, kind: output, shape index: {}]  }
   0x1   :  { %v4_v0 = vld [vmem:[%s28_s0] ss:$0 sm:$0xff] }
   0x2   :  { %5 = vst [vmem:[%s29_s1] sm:$0xff] %v4_v0  ;;  %8 = vst [vmem:[%s29_s1 + $0x8] sm:$0xff] %v4_v0 }

// kernel: tile.24
= control target key start
LH: loop header
LB: loop body
LE: loop exit
PB: predicated region body
PF: predicated region fallthrough
CT: control target
= control target key end

     0   :  { %s131_s10 = smov 60   ;;  %s132_s11 = smov 52   ;;  %vm3_vm0 = vcmask 31744   ;;  %vm9_vm1 = vcmask 523744   ;;  %vm15_vm2 = vcmask 490944   ;;  %vm21_vm3 = vcmask 458144   ;;  %s207_s0 = inlined_call_operand.vmem [shape: f32[16,4], index: 0, kind: input, shape index: {}]   ;;  %s208_s1 = inlined_call_operand.vmem [shape: f32[1,64], index: 1, kind: output, shape index: {}]  }
   0x1   :  { %v101_v0 = vld [vmem:[%s207_s0 + $0xf] sm:$0x1]   ;;  %v103_v1 = vld [vmem:[%s207_s0 + $0xd] sm:$0x1]   ;;  %v102_v2 = vld [vmem:[%s207_s0 + $0xe] sm:$0x1]  }
   0x2   :  { %7 = vrot.lane.b32.xlu0 %v101_v0, %s131_s10  ;;  %19 = vrot.lane.b32.xlu1 %v103_v1, %s132_s11  ;;  %v104_v3 = vld [vmem:[%s207_s0 + $0xc] sm:$0x1]   ;;  %s133_s16 = smov 56   ;;  %s134_s17 = smov 48   ;;  %v105_v4 = vld [vmem:[%s207_s0 + $0xb] sm:$0x1]  }
   0x3   :  { %v106_v5 = vld [vmem:[%s207_s0 + $0xa] sm:$0x1]   ;;  %v2_v6 = vld [vmem:[%s207_s0] sm:$0x1]   ;;  %s135_s24 = smov 44   ;;  %s136_s25 = smov 40  }
   0x4   :  { %4 = vst.msk [vmem:[#allocation0] sm:$0x1] %vm3_vm0, %v2_v6   ;;  %v107_v7 = vld [vmem:[%s207_s0 + $0x9] sm:$0x1]   ;;  %v108_v8 = vld [vmem:[%s207_s0 + $0x8] sm:$0x1]  }
   0x5   :  { %s137_s30 = smov 36   ;;  %s138_s2 = smov 32   ;;  %v109_v9 = vld [vmem:[%s207_s0 + $0x7] sm:$0x1]   ;;  %v110_v10 = vld [vmem:[%s207_s0 + $0x6] sm:$0x1]  }
   0x6   :  { %13 = vrot.lane.b32.xlu0 %v102_v2, %s133_s16  ;;  %25 = vrot.lane.b32.xlu1 %v104_v3, %s134_s17  ;;  %s139_s7 = smov 28   ;;  %s140_s8 = smov 24   ;;  %v111_v11 = vld [vmem:[%s207_s0 + $0x5] sm:$0x1]   ;;  %v112_v12 = vld [vmem:[%s207_s0 + $0x4] sm:$0x1]  }
   0x7   :  { %s141_s13 = smov 20   ;;  %s142_s14 = smov 16   ;;  %v113_v13 = vld [vmem:[%s207_s0 + $0x3] sm:$0x1]   ;;  %v114_v14 = vld [vmem:[%s207_s0 + $0x2] sm:$0x1]  }
   0x8   :  { %s143_s19 = smov 12   ;;  %s144_s20 = smov 8   ;;  %v115_v15 = vld [vmem:[%s207_s0 + $0x1] sm:$0x1]   ;;  %vm27_vm4 = vcmask 425344   ;;  %vm33_vm5 = vcmask 392544  }
   0x9   :  { %s145_s0 = smov 4   ;;  %vm39_vm6 = vcmask 359744   ;;  %vm45_vm7 = vcmask 326944   ;;  %vm51_vm8 = vcmask 294144   ;;  %vm57_vm9 = vcmask 261344  }
   0xa   :  { %31 = vrot.lane.b32.xlu0 %v105_v4, %s135_s24  ;;  %37 = vrot.lane.b32.xlu1 %v106_v5, %s136_s25  ;;  %vm63_vm10 = vcmask 228544   ;;  %vm69_vm11 = vcmask 195744   ;;  %vm75_vm12 = vcmask 162944   ;;  %vm81_vm13 = vcmask 130144  }
   0xb   :  { %vm87_vm14 = vcmask 97344   ;;  %vm93_vm15 = vcmask 64544  }
   0xe   :  { %43 = vrot.lane.b32.xlu0 %v107_v7, %s137_s30  ;;  %49 = vrot.lane.b32.xlu1 %v108_v8, %s138_s2 }
  0x12   :  { %55 = vrot.lane.b32.xlu0 %v109_v9, %s139_s7  ;;  %61 = vrot.lane.b32.xlu1 %v110_v10, %s140_s8 }
  0x16   :  { %67 = vrot.lane.b32.xlu0 %v111_v11, %s141_s13  ;;  %73 = vrot.lane.b32.xlu1 %v112_v12, %s142_s14 }
  0x1a   :  { %79 = vrot.lane.b32.xlu0 %v113_v13, %s143_s19  ;;  %85 = vrot.lane.b32.xlu1 %v114_v14, %s144_s20 }
  0x1e   :  { %91 = vrot.lane.b32.xlu0 %v115_v15, %s145_s0 }
  0x74   :  { %v8_v16 = vpop.permute.xlu0 %7   ;;  %v20_v17 = vpop.permute.xlu1 %19  }
  0x75   :  { %10 = vst.msk [vmem:[#allocation0] sm:$0x1] %vm9_vm1, %v8_v16  }
  0x78   :  { %v14_v18 = vpop.permute.xlu0 %13   ;;  %v26_v19 = vpop.permute.xlu1 %25  }
  0x79   :  { %16 = vst.msk [vmem:[#allocation0] sm:$0x1] %vm15_vm2, %v14_v18  }
  0x7a   :  { %22 = vst.msk [vmem:[#allocation0] sm:$0x1] %vm21_vm3, %v20_v17  }
  0x7b   :  { %28 = vst.msk [vmem:[#allocation0] sm:$0x1] %vm27_vm4, %v26_v19  }
  0x7c   :  { %v32_v20 = vpop.permute.xlu0 %31   ;;  %v38_v21 = vpop.permute.xlu1 %37  }
  0x7d   :  { %34 = vst.msk [vmem:[#allocation0] sm:$0x1] %vm33_vm5, %v32_v20  }
  0x7e   :  { %40 = vst.msk [vmem:[#allocation0] sm:$0x1] %vm39_vm6, %v38_v21  }
  0x80   :  { %v44_v22 = vpop.permute.xlu0 %43   ;;  %v50_v23 = vpop.permute.xlu1 %49  }
  0x81   :  { %46 = vst.msk [vmem:[#allocation0] sm:$0x1] %vm45_vm7, %v44_v22  }
  0x82   :  { %52 = vst.msk [vmem:[#allocation0] sm:$0x1] %vm51_vm8, %v50_v23  }
  0x84   :  { %v56_v24 = vpop.permute.xlu0 %55   ;;  %v62_v25 = vpop.permute.xlu1 %61  }
  0x85   :  { %58 = vst.msk [vmem:[#allocation0] sm:$0x1] %vm57_vm9, %v56_v24  }
  0x86   :  { %64 = vst.msk [vmem:[#allocation0] sm:$0x1] %vm63_vm10, %v62_v25  }
  0x88   :  { %v68_v26 = vpop.permute.xlu0 %67   ;;  %v74_v27 = vpop.permute.xlu1 %73  }
  0x89   :  { %70 = vst.msk [vmem:[#allocation0] sm:$0x1] %vm69_vm11, %v68_v26  }
  0x8a   :  { %76 = vst.msk [vmem:[#allocation0] sm:$0x1] %vm75_vm12, %v74_v27  }
  0x8c   :  { %v80_v28 = vpop.permute.xlu0 %79   ;;  %v86_v29 = vpop.permute.xlu1 %85  }
  0x8d   :  { %82 = vst.msk [vmem:[#allocation0] sm:$0x1] %vm81_vm13, %v80_v28  }
  0x8e   :  { %88 = vst.msk [vmem:[#allocation0] sm:$0x1] %vm87_vm14, %v86_v29  }
  0x90   :  { %v92_v30 = vpop.permute.xlu0 %91  }
  0x91   :  { %94 = vst.msk [vmem:[#allocation0] sm:$0x1] %vm93_vm15, %v92_v30  }
  0x98   :  { %v98_v31 = vld [vmem:[#allocation0] sm:$0x1] }
  0x99   :  { %100 = vst [vmem:[%s208_s1] sm:$0x1] %v98_v31 }

// kernel: basic_block_forward.1
= control target key start
LH: loop header
LB: loop body
LE: loop exit
PB: predicated region body
PF: predicated region fallthrough
CT: control target
= control target key end

     0   :  { %s1322_s24 = smov 0   ;;  %s1498_s0 = inlined_call_operand.vmem [shape: f32[2,16,64], index: 0, kind: input, shape index: {}]   ;;  %s1499_s1 = inlined_call_operand.vmem [shape: bf16[3,64,64], index: 1, kind: input, shape index: {}]   ;;  %s1500_s2 = inlined_call_operand.vmem [shape: f32[1,64], index: 2, kind: input, shape index: {}]   ;;  %s1501_s3 = inlined_call_operand.vmem [shape: f32[1,64], index: 3, kind: input, shape index: {}]   ;;  %s1502_s4 = inlined_call_operand.vmem [shape: bf16[3,64,64], index: 4, kind: input, shape index: {}]   ;;  %s1503_s5 = inlined_call_operand.vmem [shape: f32[1,64], index: 5, kind: input, shape index: {}]   ;;  %s1504_s6 = inlined_call_operand.vmem [shape: f32[1,64], index: 6, kind: input, shape index: {}]   ;;  %s1505_s7 = inlined_call_operand.vmem [shape: f32[2,16,64], index: 7, kind: output, shape index: {}]  }
   0x1 LB: > { %s1011_s25 = sadd.s32 4294967295, %s1278_s24   ;;  %p1015_p0 = scmp.ge.s32.totalorder %s1278_s24, 1  ;;  %s1278_s24 = sphi %s1322_s24, %s17_s24  }
   0x2   : > { %p237_p1 = scmp.lt.s32.totalorder %s1278_s24, 3 }
   0x4   : > { %p238_p2 = pnand %p1015_p0, %p237_p1 }
   0x5   : > { %v1241_v0 = vld [vmem:[%s1499_s1 + $0x20] sm:$0xff] (!%p238_p2)   ;;  %p269_p3 = scmp.lt.s32.totalorder (!%p238_p2), %s1011_s25, 1  ;;  %v1242_v1 = vld [vmem:[%s1499_s1 + $0x28] sm:$0xff] (!%p238_p2)   ;;  %vm280_vm0 = vcmask (!%p238_p2), 516096   ;;  %v1243_v2 = vld [vmem:[%s1499_s1 + $0x30] sm:$0xff] (!%p238_p2)   ;;  %vm299_vm3 = vcmask (!%p238_p2), 1040384  }
   0x6   : > { %241 = sbr.rel (%p238_p2) target bundleno = 576 (0x240), region = 48  ;;  %1143 = vmatprep.subr.bf16.mxu0 (!%p238_p2), %v1241_v0  ;;  %vm281_vm1 = vsmask.f32 (!%p238_p2), 256  ;;  %v283_v3 = vld [vmem:[#allocation2] sm:$0x1] (!%p238_p2)  ;;  %v1244_v5 = vld [vmem:[%s1499_s1 + $0x38] sm:$0xff] (!%p238_p2)  }
   0x7   : > { %1144 = vmatpush3.bf16.msra.mxu0 (!%p238_p2), %v1241_v0  ;;  %vm1348_vm2 = vmand (!%p238_p2), %vm280_vm0, %vm281_vm1  ;;  %vm300_vm4 = vcmask (!%p238_p2), 1044484   ;;  %vm286_vm5 = vsmask.f32 (!%p238_p2), 7938  ;;  %vm310_vm6 = vcmask (!%p238_p2), 519169   ;;  %vm312_vm7 = vcmask (!%p238_p2), 519168   ;;  %v1247_v16 = vld [vmem:[%s1499_s1] sm:$0xff] (!%p238_p2)  }
   0x8   : > { %1145 = vmatprep.subr.bf16.mxu0 (!%p238_p2), %v1242_v1  ;;  %v284_v6 = vsel (!%p238_p2), %vm1348_vm2, 0, %v283_v3  ;;  %vm301_vm8 = vmor (!%p238_p2), %vm299_vm3, %vm300_vm4  ;;  %vm317_vm9 = vsmask.f32 (!%p238_p2), 1280  ;;  %vm316_vm11 = vcmask (!%p238_p2), 517121   ;;  %v319_v20 = vld [vmem:[#allocation2 + $0x8] sm:$0x2] (!%p238_p2) }
   0x9   : > { %285 = vst [vmem:[#allocation2] sm:$0x1] (!%p238_p2), %v284_v6  ;;  %vm1366_vm10 = vmand (!%p238_p2), %vm280_vm0, %vm286_vm5  ;;  %vm350_vm13 = vsmask.f32 (!%p238_p2), 7424  ;;  %vm389_vm14 = vcmask (!%p238_p2), 523264   ;;  %v1248_v34 = vld [vmem:[%s1499_s1 + $0x8] sm:$0xff] (!%p238_p2)  }
   0xa   : > { %vm318_vm12 = vmand (!%p238_p2), %vm316_vm11, %vm317_vm9  ;;  %v1249_v35 = vld [vmem:[%s1499_s1 + $0x10] sm:$0xff] (!%p238_p2)   ;;  %v1250_v37 = vld [vmem:[%s1499_s1 + $0x18] sm:$0xff] (!%p238_p2)   ;;  %vm537_vm15 = vcmask (!%p238_p2), 1046528   ;;  %v1280_v48 = vmov (!%p238_p2), 0.0  }
   0xb   : > { %1146 = vmatpush3.bf16.msra.mxu0 (!%p238_p2), %v1242_v1  ;;  %v320_v21 = vsel (!%p238_p2), %vm318_vm12, 0, %v319_v20  ;;  %v1251_v40 = vld [vmem:[%s1499_s1 + $0x40] sm:$0xff] (!%p238_p2)   ;;  %v1252_v43 = vld [vmem:[%s1499_s1 + $0x48] sm:$0xff] (!%p238_p2)   ;;  %v1253_v45 = vld [vmem:[%s1499_s1 + $0x50] sm:$0xff] (!%p238_p2)   ;;  %1179 = vmatprep.subr.bf16.mxu1 (!%p238_p2), %v1280_v48 }
   0xc   : > { %1147 = vmatprep.subr.bf16.mxu0 (!%p238_p2), %v1243_v2  ;;  %321 = vst [vmem:[#allocation2 + $0x8] sm:$0x2] (!%p238_p2), %v320_v21  ;;  %v1254_v46 = vld [vmem:[%s1499_s1 + $0x58] sm:$0xff] (!%p238_p2)   ;;  %v1257_v47 = vld [vmem:[%s1502_s4 + $0x20] sm:$0xff] (!%p238_p2)   ;;  %v1258_v49 = vld [vmem:[%s1502_s4 + $0x28] sm:$0xff] (!%p238_p2)  }
   0xd   : > { %s1511_s25 = smov (!%p269_p3, %s1011_s25), 1  ;;  %1180 = vmatpush3.bf16.msra.mxu1 %v1257_v47  ;;  %v1259_v50 = vld [vmem:[%s1502_s4 + $0x30] sm:$0xff]   ;;  %v1260_v51 = vld [vmem:[%s1502_s4 + $0x38] sm:$0xff]   ;;  %v1060_v52 = vld [vmem:[%s1500_s2] ss:$0 sm:$0xff] }
   0xe   : > { %s1103_s9 = sshll.u32 %s1511_s25, 4  ;;  %1181 = vmatprep.subr.bf16.mxu1 %v1280_v48  ;;  %v1061_v54 = vld [vmem:[%s1501_s3] ss:$0 sm:$0xff]  ;;  %v660_v0 = vld [vmem:[#allocation3 + $0x8] sm:$0x1]  ;;  %v1264_v4 = vld [vmem:[%s1502_s4 + $0x8] sm:$0xff]  }
   0xf   : > { %s273_s12 = scalar_lea.vmem %s1498_s0, %s1103_s9  ;;  %1148 = vmatpush3.bf16.msra.mxu0 %v1243_v2  ;;  %v1263_v13 = vld [vmem:[%s1502_s4] sm:$0xff]   ;;  %s278_s27 = scalar_lea.vmem %s1505_s7, %s1103_s9 }
  0x10   : > { %v1357_v7 = vld [vmem:[%s273_s12] sm:$0xff]  ;;  %v1359_v8 = vld [vmem:[%s273_s12 + $0x8] sm:$0xff]  ;;  %1149 = vmatprep.subr.bf16.mxu0 %v1244_v5 }
  0x11   : > { %v1105_v9 = vpack.c.bf16 %v1357_v7, %v1357_v7  ;;  %v1106_v10 = vpack.c.bf16 %v1359_v8, %v1359_v8  ;;  %v288_v18 = vld [vmem:[#allocation2] sm:$0x1]  ;;  %1182 = vmatpush3.bf16.msra.mxu1 %v1258_v49 }
  0x12   : > { %v289_v19 = vsel %vm1366_vm10, 0, %v288_v18  ;;  %1183 = vmatprep.subr.bf16.mxu1 %v1280_v48 }
  0x13   : > { %v302_v11 = vrot.slane %v1105_v9, 7  ;;  %v304_v12 = vrot.slane %v1106_v10, 7  ;;  %1150 = vmatpush3.bf16.msra.mxu0 %v1244_v5  ;;  %290 = vst [vmem:[#allocation2] sm:$0x1] %v289_v19 }
  0x14   : > { %1155 = vmatprep.subr.bf16.mxu0 %v1247_v16 }
  0x15   : > { %v303_v14 = vrot.slane %v302_v11, 4  ;;  %v306_v15 = vrot.slane %v304_v12, 4  ;;  %311 = vst.msk [vmem:[#allocation2] sm:$0xe] %vm310_vm6, %v302_v11  ;;  %1184 = vmatpush3.bf16.msra.mxu1 %v1259_v50 }
  0x16   : > { %1185 = vmatprep.subr.bf16.mxu1 %v1280_v48 }
  0x17   : > { %v305_v17 = vsel %vm301_vm8, %v303_v14, %v304_v12  ;;  %315 = vst.msk [vmem:[#allocation2 + $0x8] sm:$0x1] %vm280_vm0, %v306_v15  ;;  %vm1281_vm0 = vmmov 0  }
  0x18   : > { %313 = vst.msk [vmem:[#allocation2 + $0x4] sm:$0xf] %vm312_vm7, %v305_v17  ;;  %1187 = vmatprep.mubr.msk.bf16.mxu1 %vm1281_vm0, %v1280_v48 }
  0x19   : > { %1186 = vmatpush3.bf16.msra.mxu1 %v1260_v51 }
  0x1a   : > { %1191 = vmatprep.subr.bf16.mxu1 %v1280_v48 }
  0x1c   : > { %v322_v24 = vld [vmem:[#allocation2] sm:$0xf] }
  0x1d   : > { %v520_v36 = vld [vmem:[#allocation2] sm:$0xe] }
  0x1e   : > { %v1246_v22 = vld [vmem:[#allocation2 + $0x8] ss:$0 sps:$4 sm:$0x11]  }
  0x1f   : > { %v323_v23 = vld [vmem:[#allocation2 + $0x4] sm:$0xf]  ;;  %v359_v26 = vshll.u32 %v1246_v22, 16  ;;  %v363_v32 = vshrl.u32 %v1246_v22, 16 }
  0x20   : > { %v1030_v25 = vcombine.low %v322_v24, %v323_v23  ;;  %v1052_v38 = vcombine.low %v520_v36, %v323_v23  ;;  %v1256_v39 = vld [vmem:[#allocation2 + $0x8] ss:$0 sps:$4 sm:$0x33]  }
  0x21   : > { %v361_v30 = vrot.slane %v359_v26, 1  ;;  %v539_v42 = vrot.slane %v1256_v39, 1 }
  0x22   : > { %v352_v27 = vshrl.u32 %v1030_v25, 16  ;;  %v354_v28 = vshll.u32 %v1030_v25, 16  ;;  %v538_v41 = vrot.slane %v1052_v38, 1  ;;  %v1099_v38 = vld [vmem:[%s1503_s5] ss:$0 sm:$0xff] }
  0x24   : > { %v356_v29 = vrot.slane %v354_v28, 1  ;;  %v540_v44 = vsel %vm537_vm15, %v538_v41, %v539_v42  ;;  %v1266_v28 = vld [vmem:[%s1502_s4 + $0x18] sm:$0xff]  }
  0x26   : > { %v357_v31 = vor.u32 %v356_v29, %v352_v27  ;;  %v1265_v27 = vld [vmem:[%s1502_s4 + $0x10] sm:$0xff]   ;;  %v1267_v29 = vld [vmem:[%s1502_s4 + $0x40] sm:$0xff]  }
  0x28   : > { %v362_v33 = vsel %vm350_vm13, %v357_v31, %v361_v30  ;;  %v1268_v30 = vld [vmem:[%s1502_s4 + $0x48] sm:$0xff]   ;;  %v1269_v31 = vld [vmem:[%s1502_s4 + $0x50] sm:$0xff]  }
  0x29   : > { %1151 = vmatprep.mubr.msk.bf16.mxu0 %vm389_vm14, %v362_v33  ;;  %v1270_v33 = vld [vmem:[%s1502_s4 + $0x58] sm:$0xff]  }
  0x2a   : > { %1152 = vmatmul.mubr.msk.bf16.vlgmr.msra.gmra.mrb[0].mxu0 %vm389_vm14, %v363_v32 }
  0x2b   : > { %1156 = vmatpush3.bf16.msra.mxu0 %v1247_v16  ;;  %1163 = vmatprep.mubr.msk.bf16.mxu0 %vm389_vm14, %v1030_v25 }
  0x2c   : > { %1157 = vmatprep.subr.bf16.mxu0 %v1248_v34 }
  0x2f   : > { %1158 = vmatpush3.bf16.msra.mxu0 %v1248_v34 }
  0x30   : > { %1159 = vmatprep.subr.bf16.mxu0 %v1249_v35 }
  0x33   : > { %1160 = vmatpush3.bf16.msra.mxu0 %v1249_v35 }
  0x34   : > { %1161 = vmatprep.subr.bf16.mxu0 %v1250_v37 }
  0x37   : > { %1162 = vmatpush3.bf16.msra.mxu0 %v1250_v37 }
  0x38   : > { %1167 = vmatprep.subr.bf16.mxu0 %v1251_v40 }
  0x3a   : > { %1164 = vmatmul.mubr.msk.bf16.vlgmr.msra.gmra.mrb[0].mxu0 %vm389_vm14, %v1246_v22 }
  0x3b   : > { %1168 = vmatpush3.bf16.msra.mxu0 %v1251_v40  ;;  %1175 = vmatprep.mubr.msk.bf16.mxu0 %vm389_vm14, %v540_v44  ;;  %v1100_v40 = vld [vmem:[%s1504_s6] ss:$0 sm:$0xff] }
  0x3c   : > { %1169 = vmatprep.subr.bf16.mxu0 %v1252_v43 }
  0x3f   : > { %1170 = vmatpush3.bf16.msra.mxu0 %v1252_v43 }
  0x40   : > { %1171 = vmatprep.subr.bf16.mxu0 %v1253_v45 }
  0x43   : > { %1172 = vmatpush3.bf16.msra.mxu0 %v1253_v45 }
  0x44   : > { %1173 = vmatprep.subr.bf16.mxu0 %v1254_v46 }
  0x47   : > { %1174 = vmatpush3.bf16.msra.mxu0 %v1254_v46 }
  0x4a   : > { %1176 = vmatmul.mubr.msk.bf16.vlgmr.msra.gmra.mrb[0].mxu0 %vm389_vm14, %v539_v42 }
 0x11d   : > { %v1177_v53 = vpop.f32.mrb[0].mxu0 }
 0x11e   : > { %v631_v55 = vmul.f32 %v1177_v53, %v1060_v52  ;;  %v605_v56 = vpop.f32.mrb[1].mxu0 }
 0x11f   : > { %v629_v57 = vmul.f32 %v1060_v52, %v605_v56  ;;  %v1178_v58 = vpop.f32.mrb[2].mxu0 }
 0x120   : > { %v641_v59 = vadd.f32 %v1061_v54, %v631_v55  ;;  %v608_v60 = vpop.f32.mrb[3].mxu0 }
 0x121   : > { %v639_v61 = vadd.f32 %v1061_v54, %v629_v57  ;;  %v630_v62 = vmul.f32 %v1060_v52, %v608_v60 }
 0x122   : > { %v644_v63 = vmax.f32 %v641_v59, 0.0 }
 0x123   : > { %v642_v1 = vmax.f32 %v639_v61, 0.0  ;;  %v640_v2 = vadd.f32 %v1061_v54, %v630_v62 }
 0x124   : > { %v1109_v3 = vpack.c.bf16 %v644_v63, %v644_v63 }
 0x125   : > { %v1107_v5 = vpack.c.bf16 %v642_v1, %v642_v1  ;;  %v643_v6 = vmax.f32 %v640_v2, 0.0 }
 0x126   : > { %v661_v9 = vsel %vm1348_vm2, %v1109_v3, %v660_v0 }
 0x127   : > { %662 = vst [vmem:[#allocation3 + $0x8] sm:$0x1] %v661_v9  ;;  %658 = vst.msk [vmem:[#allocation3] sm:$0xf] %vm312_vm7, %v1107_v5  ;;  %v1108_v10 = vpack.c.bf16 %v643_v6, %v643_v6 }
 0x129   : > { %659 = vst.msk [vmem:[#allocation3 + $0x4] sm:$0xf] %vm312_vm7, %v1108_v10 }
 0x12e   : > { %v666_v11 = vld [vmem:[#allocation3 + $0x8] sm:$0x1]  ;;  %v663_v12 = vld [vmem:[#allocation3] sm:$0x1]  ;;  %v844_v32 = vld [vmem:[#allocation3] sm:$0xe] }
 0x12f   : > { %v667_v14 = vsel %vm1366_vm10, 0, %v666_v11  ;;  %v664_v15 = vsel %vm1348_vm2, 0, %v663_v12 }
 0x130   : > { %668 = vst [vmem:[#allocation3 + $0x8] sm:$0x1] %v667_v14  ;;  %665 = vst [vmem:[#allocation3] sm:$0x1] %v664_v15  ;;  %v670_v17 = vld [vmem:[#allocation3 + $0x4] sm:$0xf] }
 0x131   : > { %v1093_v34 = vcombine.low %v844_v32, %v670_v17 }
 0x133   : > { %v857_v36 = vrot.slane %v1093_v34, 1 }
 0x137   : > { %v669_v16 = vld [vmem:[#allocation3] sm:$0xf]  ;;  %v1262_v19 = vld [vmem:[#allocation3 + $0x8] ss:$0 sps:$4 sm:$0x11]  }
 0x138   : > { %v1073_v18 = vcombine.low %v669_v16, %v670_v17  ;;  %v705_v21 = vshll.u32 %v1262_v19, 16  ;;  %v858_v35 = vrot.slane %v1262_v19, 1 }
 0x13a   : > { %v700_v20 = vshll.u32 %v1073_v18, 16  ;;  %v698_v22 = vshrl.u32 %v1073_v18, 16  ;;  %v707_v25 = vrot.slane %v705_v21, 1  ;;  %v859_v37 = vsel %vm537_vm15, %v857_v36, %v858_v35 }
 0x13c   : > { %v702_v23 = vrot.slane %v700_v20, 1 }
 0x13e   : > { %v703_v24 = vor.u32 %v702_v23, %v698_v22 }
 0x140   : > { %v708_v26 = vsel %vm350_vm13, %v703_v24, %v707_v25 }
 0x141   : > { %1188 = vmatmul.mubr.msk.bf16.vlgmr.msra.gmra.mrb[0].mxu1 %vm389_vm14, %v708_v26 }
 0x142   : > { %1192 = vmatpush3.bf16.msra.mxu1 %v1263_v13  ;;  %1199 = vmatprep.mubr.msk.bf16.mxu1 %vm1281_vm0, %v1280_v48 }
 0x143   : > { %1193 = vmatprep.subr.bf16.mxu1 %v1280_v48 }
 0x146   : > { %1194 = vmatpush3.bf16.msra.mxu1 %v1264_v4 }
 0x147   : > { %1195 = vmatprep.subr.bf16.mxu1 %v1280_v48 }
 0x14a   : > { %1196 = vmatpush3.bf16.msra.mxu1 %v1265_v27 }
 0x14b   : > { %1197 = vmatprep.subr.bf16.mxu1 %v1280_v48 }
 0x14e   : > { %1198 = vmatpush3.bf16.msra.mxu1 %v1266_v28 }
 0x14f   : > { %1203 = vmatprep.subr.bf16.mxu1 %v1280_v48 }
 0x151   : > { %1200 = vmatmul.mubr.msk.bf16.vlgmr.msra.gmra.mrb[0].mxu1 %vm389_vm14, %v1073_v18 }
 0x152   : > { %1204 = vmatpush3.bf16.msra.mxu1 %v1267_v29  ;;  %1211 = vmatprep.mubr.msk.bf16.mxu1 %vm1281_vm0, %v1280_v48 }
 0x153   : > { %1205 = vmatprep.subr.bf16.mxu1 %v1280_v48 }
 0x156   : > { %1206 = vmatpush3.bf16.msra.mxu1 %v1268_v30 }
 0x157   : > { %1207 = vmatprep.subr.bf16.mxu1 %v1280_v48 }
 0x15a   : > { %1208 = vmatpush3.bf16.msra.mxu1 %v1269_v31 }
 0x15b   : > { %1209 = vmatprep.subr.bf16.mxu1 %v1280_v48 }
 0x15e   : > { %1210 = vmatpush3.bf16.msra.mxu1 %v1270_v33 }
 0x161   : > { %1212 = vmatmul.mubr.msk.bf16.vlgmr.msra.gmra.mrb[0].mxu1 %vm389_vm14, %v859_v37 }
 0x234   : > { %v921_v39 = vpop.f32.mrb[0].mxu1 }
 0x235   : > { %v937_v41 = vmul.f32 %v1099_v38, %v921_v39  ;;  %v1213_v42 = vpop.f32.mrb[1].mxu1 }
 0x236   : > { %v924_v43 = vpop.f32.mrb[2].mxu1 }
 0x237   : > { %v946_v44 = vadd.f32 %v1100_v40, %v937_v41  ;;  %v938_v45 = vmul.f32 %v1099_v38, %v924_v43  ;;  %v1214_v46 = vpop.f32.mrb[3].mxu1 }
 0x239   : > { %v950_v47 = vadd.f32 %v946_v44, %v1357_v7  ;;  %v947_v48 = vadd.f32 %v1100_v40, %v938_v45 }
 0x23b   : > { %v952_v49 = vmax.f32 %v950_v47, 0.0  ;;  %v951_v50 = vadd.f32 %v947_v48, %v1359_v8 }
 0x23d   : > { %954 = vst.msk [vmem:[%s278_s27] sm:$0xff] %vm389_vm14, %v952_v49  ;;  %v953_v51 = vmax.f32 %v951_v50, 0.0 }
 0x23f   : > { %955 = vst.msk [vmem:[%s278_s27 + $0x8] sm:$0xff] %vm389_vm14, %v953_v51 }
 0x240 PF: > { %s17_s24 = sadd.s32 1, %s1278_s24  }
 0x241   : > { %p14_p4 = scmp.ge.s32.totalorder %s17_s24, 4  }
 0x243   :  { %16 = sbr.rel (!%p14_p4) target bundleno = 1 (0x1), region = 82 }

</bundles_post_ra>
